<compile_context>
chip_gen: v7x
topology: tpu7x:2x2x1
jax: 0.10.0
libtpu: 0.0.40
codegen_flags: <defaults>
</compile_context>

<pallas_src>
import functools
import math

import jax
import jax.numpy as jnp
from jax.experimental import pallas as pl
from jax.experimental.pallas import tpu as pltpu

input_size = 784
hidden_size = 32
num_classes = 10

_LANE = 128
_SUBLANE = 8
N_PAD = pl.cdiv(num_classes, _LANE) * _LANE   # 128 (lane-dense output)


def _round_up(x, m):
    return ((x + m - 1) // m) * m


def mlp_kernel(x_ref, w1_ref, b1_ref, w2_ref, b2_ref, o_ref, *, bf16_matmul):
    x = x_ref[...]
    w1 = w1_ref[...]
    if bf16_matmul:
        # In-kernel cast: no extra HBM traffic; fc1 (K=784) runs at the bf16
        # MXU rate instead of the 4-8x slower f32 path.
        x = x.astype(jnp.bfloat16)
        w1 = w1.astype(jnp.bfloat16)
    h = jnp.dot(x, w1, preferred_element_type=jnp.float32)       # fc1 (MXU)
    h = jnp.maximum(h + b1_ref[...], 0.0)                        # bias+ReLU, f32 VPU
    # fc2 is tiny (K=32): keep it in full f32 for accuracy; cost is negligible.
    out = jnp.dot(h, w2_ref[...], preferred_element_type=jnp.float32)
    o_ref[...] = (out + b2_ref[...]).astype(o_ref.dtype)


@functools.partial(jax.jit, static_argnames=("block_b", "bf16_matmul"))
def simple_mlp_forward(x, w1, b1, w2, b2, *, block_b=1024, bf16_matmul=True):
    """x: (B, input_size) f32.  Returns (B, num_classes) f32.

    w1: (input_size, hidden), b1: (1, hidden),
    w2: (hidden, num_classes), b2: (1, num_classes).
    """
    B, K = x.shape
    H = w1.shape[1]

    # ---- batch tile selection (no batch padding; Pallas masks partial blocks)
    TB = min(block_b, _round_up(B, _SUBLANE))
    # Give v7x's two TensorCores at least two "parallel" grid blocks to shard.
    if B > 2 * _SUBLANE and pl.cdiv(B, TB) < 2:
        TB = max(_SUBLANE, _round_up(pl.cdiv(B, 2), _SUBLANE))
    grid = (pl.cdiv(B, TB),)

    # ---- tiny one-time padding on the weight side only (class dim 10 -> 128)
    w2p = jnp.pad(w2, ((0, 0), (0, N_PAD - num_classes)))
    b2p = jnp.pad(b2, ((0, 0), (0, N_PAD - num_classes)))
    b1p = b1.astype(jnp.float32)

    flops = 2 * B * (K * H + H * N_PAD)
    bytes_accessed = (B * K * 4                      # x stream (dominant)
                      + (K * H + H * N_PAD) * 4      # resident weights
                      + (H + N_PAD) * 4              # biases
                      + B * N_PAD * 4)               # output stream

    # VMEM working set: x + out double buffers dominate.  Raise the scoped
    # limit only if needed (v5e default ~16 MiB); stay < 48 MiB for v7x.
    vmem_needed = (2 * TB * (K + N_PAD) * 4
                   + 2 * (K * H + H * N_PAD + H + N_PAD) * 4)
    vmem_limit = None
    if vmem_needed > (14 << 20):
        vmem_limit = min(vmem_needed + (8 << 20), 48 << 20)

    out = pl.pallas_call(
        functools.partial(mlp_kernel, bf16_matmul=bf16_matmul),
        out_shape=jax.ShapeDtypeStruct((B, N_PAD), jnp.float32),
        grid_spec=pltpu.PrefetchScalarGridSpec(
            num_scalar_prefetch=0,
            grid=grid,
            in_specs=[
                # x: streamed per batch tile (default double-buffering).
                pl.BlockSpec((TB, K), lambda i: (i, 0)),
                # Weights / biases: constant block index -> fetched once, resident.
                pl.BlockSpec((K, H), lambda i: (0, 0)),
                pl.BlockSpec((1, H), lambda i: (0, 0)),
                pl.BlockSpec((H, N_PAD), lambda i: (0, 0)),
                pl.BlockSpec((1, N_PAD), lambda i: (0, 0)),
            ],
            out_specs=pl.BlockSpec((TB, N_PAD), lambda i: (i, 0)),
        ),
        compiler_params=pltpu.CompilerParams(
            dimension_semantics=("parallel",),
            vmem_limit_bytes=vmem_limit,
        ),
        cost_estimate=pl.CostEstimate(
            flops=flops, transcendentals=0, bytes_accessed=bytes_accessed),
    )(x, w1, b1p, w2p, b2p)

    # Slice away the lane padding on the class dim.  (If the consumer can take
    # the padded (B, 128) slab directly, skip this extra pass.)
    return out[:, :num_classes]


def init_params(key):
    """Deterministic init matching nn.Linear's default U(-1/sqrt(fan_in), ...)."""
    k1, k2, k3, k4 = jax.random.split(key, 4)
    bound1 = 1.0 / math.sqrt(input_size)
    bound2 = 1.0 / math.sqrt(hidden_size)
    # stored as (in, out) so the kernel can do x @ W without a transpose
    w1 = jax.random.uniform(k1, (input_size, hidden_size), jnp.float32, -bound1, bound1)
    b1 = jax.random.uniform(k2, (1, hidden_size), jnp.float32, -bound1, bound1)
    w2 = jax.random.uniform(k3, (hidden_size, num_classes), jnp.float32, -bound2, bound2)
    b2 = jax.random.uniform(k4, (1, num_classes), jnp.float32, -bound2, bound2)
    return w1, b1, w2, b2


if __name__ == "__main__":
    key = jax.random.PRNGKey(0)
    kx, kx2, kp = jax.random.split(key, 3)
    w1, b1, w2, b2 = init_params(kp)

    def ref_forward(x, *, bf16):
        if bf16:
            h = jnp.dot(x.astype(jnp.bfloat16), w1.astype(jnp.bfloat16),
                        preferred_element_type=jnp.float32)
        else:
            h = x @ w1
        h = jnp.maximum(h + b1, 0.0)
        return h @ w2 + b2

    # 1) Small batch, full-f32 matmul path: tight tolerance vs f32 reference.
    batch = 8
    x = jax.random.normal(kx, (batch, input_size), jnp.float32)
    out = jax.block_until_ready(
        simple_mlp_forward(x, w1, b1, w2, b2, bf16_matmul=False))
    assert out.shape == (batch, num_classes)
    assert jnp.allclose(out, ref_forward(x, bf16=False), atol=1e-4, rtol=1e-4)

    # 2) Larger, non-tile-multiple batch, default in-kernel bf16 fc1 path:
    #    tight check vs a matched bf16 reference, loose sanity vs full f32.
    batch2 = 200
    x2 = jax.random.normal(kx2, (batch2, input_size), jnp.float32)
    out2 = jax.block_until_ready(
        simple_mlp_forward(x2, w1, b1, w2, b2, block_b=64))
    assert out2.shape == (batch2, num_classes)
    assert jnp.allclose(out2, ref_forward(x2, bf16=True), atol=1e-3, rtol=1e-3)
    assert jnp.allclose(out2, ref_forward(x2, bf16=False), atol=5e-2, rtol=5e-2)

    print("KERNEL_OK")
</pallas_src>

<mosaic_0001>
module attributes {stable_mosaic.version = 11 : i64} {
  func.func @mlp_kernel(%arg0: i32, %arg1: memref<8x784xf32, #tpu.memory_space<vmem>>, %arg2: memref<784x32xf32, #tpu.memory_space<vmem>>, %arg3: memref<1x32xf32, #tpu.memory_space<vmem>>, %arg4: memref<32x128xf32, #tpu.memory_space<vmem>>, %arg5: memref<1x128xf32, #tpu.memory_space<vmem>>, %arg6: memref<8x128xf32, #tpu.memory_space<vmem>>) attributes {dimension_semantics = [#tpu.dimension_semantics<parallel>], iteration_bounds = array<i64: 1>, scalar_prefetch = 0 : i64, scratch_operands = 0 : i64, tpu.core_type = #tpu.core_type<tc>, window_params = [{transform_indices = @transform_0, window_bounds = array<i64: 8, 784>}, {pipeline_mode = #tpu.pipeline_mode<synchronous>, transform_indices = @transform_1, window_bounds = array<i64: 784, 32>}, {pipeline_mode = #tpu.pipeline_mode<synchronous>, transform_indices = @transform_2, window_bounds = array<i64: 1, 32>}, {pipeline_mode = #tpu.pipeline_mode<synchronous>, transform_indices = @transform_3, window_bounds = array<i64: 32, 128>}, {pipeline_mode = #tpu.pipeline_mode<synchronous>, transform_indices = @transform_4, window_bounds = array<i64: 1, 128>}, {transform_indices = @transform_5, window_bounds = array<i64: 8, 128>}]} {
    %c0 = arith.constant 0 : index
    %c0_0 = arith.constant 0 : index
    %0 = vector.load %arg1[%c0, %c0_0] : memref<8x784xf32, #tpu.memory_space<vmem>>, vector<8x784xf32>
    %c0_1 = arith.constant 0 : index
    %c0_2 = arith.constant 0 : index
    %1 = vector.load %arg2[%c0_1, %c0_2] : memref<784x32xf32, #tpu.memory_space<vmem>>, vector<784x32xf32>
    %cst = arith.constant dense<0.000000e+00> : vector<8x32xf32>
    %2 = tpu.matmul %0, %1, %cst {dimension_numbers = #tpu.dot_dimension_numbers<[1], [0], [0], [1], [0, 0, 1, 1], [], []>} : vector<8x784xf32>, vector<784x32xf32>, vector<8x32xf32> -> vector<8x32xf32>
    %c0_3 = arith.constant 0 : index
    %c0_4 = arith.constant 0 : index
    %3 = vector.load %arg3[%c0_3, %c0_4] : memref<1x32xf32, #tpu.memory_space<vmem>>, vector<1x32xf32>
    %4 = vector.broadcast %3 : vector<1x32xf32> to vector<8x32xf32>
    %5 = arith.addf %2, %4 : vector<8x32xf32>
    %cst_5 = arith.constant 0.000000e+00 : f32
    %6 = vector.broadcast %cst_5 : f32 to vector<8x32xf32>
    %7 = arith.maximumf %5, %6 : vector<8x32xf32>
    %c0_6 = arith.constant 0 : index
    %c0_7 = arith.constant 0 : index
    %8 = vector.load %arg4[%c0_6, %c0_7] : memref<32x128xf32, #tpu.memory_space<vmem>>, vector<32x128xf32>
    %cst_8 = arith.constant dense<0.000000e+00> : vector<8x128xf32>
    %9 = tpu.matmul %7, %8, %cst_8 {dimension_numbers = #tpu.dot_dimension_numbers<[1], [0], [0], [1], [0, 0, 1, 1], [], []>} : vector<8x32xf32>, vector<32x128xf32>, vector<8x128xf32> -> vector<8x128xf32>
    %c0_9 = arith.constant 0 : index
    %c0_10 = arith.constant 0 : index
    %10 = vector.load %arg5[%c0_9, %c0_10] : memref<1x128xf32, #tpu.memory_space<vmem>>, vector<1x128xf32>
    %11 = vector.broadcast %10 : vector<1x128xf32> to vector<8x128xf32>
    %12 = arith.addf %9, %11 : vector<8x128xf32>
    %c0_11 = arith.constant 0 : index
    %c0_12 = arith.constant 0 : index
    %13 = vector.load %arg6[%c0_11, %c0_12] : memref<8x128xf32, #tpu.memory_space<vmem>>, vector<8x128xf32>
    tpu.vector_store %arg6[%c0_11, %c0_12], %12 {strides = array<i32>} : memref<8x128xf32, #tpu.memory_space<vmem>>, vector<8x128xf32>,
    return
  }
  func.func @transform_0(%arg0: i32) -> (i32, i32) {
    %c0_i32 = arith.constant 0 : i32
    %c0_i32_0 = arith.constant 0 : i32
    return %arg0, %c0_i32 : i32, i32
  }
  func.func @transform_1(%arg0: i32) -> (i32, i32) {
    %c0_i32 = arith.constant 0 : i32
    %c0_i32_0 = arith.constant 0 : i32
    %c0_i32_1 = arith.constant 0 : i32
    return %c0_i32, %c0_i32_0 : i32, i32
  }
  func.func @transform_2(%arg0: i32) -> (i32, i32) {
    %c0_i32 = arith.constant 0 : i32
    %c0_i32_0 = arith.constant 0 : i32
    %c0_i32_1 = arith.constant 0 : i32
    return %c0_i32, %c0_i32_0 : i32, i32
  }
  func.func @transform_3(%arg0: i32) -> (i32, i32) {
    %c0_i32 = arith.constant 0 : i32
    %c0_i32_0 = arith.constant 0 : i32
    %c0_i32_1 = arith.constant 0 : i32
    return %c0_i32, %c0_i32_0 : i32, i32
  }
  func.func @transform_4(%arg0: i32) -> (i32, i32) {
    %c0_i32 = arith.constant 0 : i32
    %c0_i32_0 = arith.constant 0 : i32
    %c0_i32_1 = arith.constant 0 : i32
    return %c0_i32, %c0_i32_0 : i32, i32
  }
  func.func @transform_5(%arg0: i32) -> (i32, i32) {
    %c0_i32 = arith.constant 0 : i32
    %c0_i32_0 = arith.constant 0 : i32
    return %arg0, %c0_i32 : i32, i32
  }
}

</mosaic_0001>

<bundles_post_ra>
// kernel: simple_mlp_forward.1
= control target key start
LH: loop header
LB: loop body
LE: loop exit
PB: predicated region body
PF: predicated region fallthrough
CT: control target
= control target key end

     0   :  { %s1168_s0 = inlined_call_operand.vmem [shape: f32[8,784], index: 0, kind: input, shape index: {}]   ;;  %s1169_s1 = inlined_call_operand.vmem [shape: f32[784,32], index: 1, kind: input, shape index: {}]   ;;  %s1170_s2 = inlined_call_operand.vmem [shape: f32[1,32], index: 2, kind: input, shape index: {}]   ;;  %s1171_s3 = inlined_call_operand.vmem [shape: f32[32,128], index: 3, kind: input, shape index: {}]   ;;  %s1172_s4 = inlined_call_operand.vmem [shape: f32[1,128], index: 4, kind: input, shape index: {}]   ;;  %s1173_s5 = inlined_call_operand.hbm [shape: f32[8,128], index: 5, kind: output, shape index: {}]  }
   0x1   :  { %v44_v0 = vld [vmem:[%s1169_s1 + $0x80] sm:$0xff]  ;;  %v45_v1 = vld [vmem:[%s1169_s1 + $0x88] sm:$0xff]  ;;  %v46_v11 = vld [vmem:[%s1169_s1 + $0x90] sm:$0xff] }
   0x2   :  { %v28_v2 = vld [vmem:[%s1169_s1] sm:$0xff]  ;;  %v653_v3 = vpack.c.bf16 %v45_v1, %v44_v0  ;;  %v29_v4 = vld [vmem:[%s1169_s1 + $0x8] sm:$0xff]  ;;  %v47_v13 = vld [vmem:[%s1169_s1 + $0x98] sm:$0xff] }
   0x3   :  { %v76_v5 = vld [vmem:[%s1169_s1 + $0x180] sm:$0xff]  ;;  %v77_v6 = vld [vmem:[%s1169_s1 + $0x188] sm:$0xff]  ;;  %v655_v7 = vpack.c.bf16 %v29_v4, %v28_v2  ;;  %v30_v14 = vld [vmem:[%s1169_s1 + $0x10] sm:$0xff]  ;;  %v657_v16 = vpack.c.bf16 %v47_v13, %v46_v11 }
   0x4   :  { %v685_v8 = vpack.c.bf16 %v77_v6, %v76_v5  ;;  %v60_v9 = vld [vmem:[%s1169_s1 + $0x100] sm:$0xff]  ;;  %v61_v10 = vld [vmem:[%s1169_s1 + $0x108] sm:$0xff]  ;;  %654 = vmatprep.subr.bf16.mxu0 %v653_v3  ;;  %v31_v15 = vld [vmem:[%s1169_s1 + $0x18] sm:$0xff] }
   0x5   :  { %v687_v12 = vpack.c.bf16 %v61_v10, %v60_v9  ;;  %656 = vmatpush3.bf16.msra.mxu0 %v655_v7  ;;  %v659_v17 = vpack.c.bf16 %v31_v15, %v30_v14  ;;  %v78_v18 = vld [vmem:[%s1169_s1 + $0x190] sm:$0xff]  ;;  %v79_v19 = vld [vmem:[%s1169_s1 + $0x198] sm:$0xff]  ;;  %v48_v23 = vld [vmem:[%s1169_s1 + $0xa0] sm:$0xff] }
   0x6   :  { %686 = vmatprep.subr.bf16.mxu1 %v685_v8  ;;  %v62_v20 = vld [vmem:[%s1169_s1 + $0x110] sm:$0xff]  ;;  %v689_v21 = vpack.c.bf16 %v79_v19, %v78_v18  ;;  %v63_v22 = vld [vmem:[%s1169_s1 + $0x118] sm:$0xff]  ;;  %v49_v24 = vld [vmem:[%s1169_s1 + $0xa8] sm:$0xff]  ;;  %658 = vmatprep.subr.bf16.mxu0 %v657_v16 }
   0x7   :  { %688 = vmatpush3.bf16.msra.mxu1 %v687_v12  ;;  %v691_v25 = vpack.c.bf16 %v63_v22, %v62_v20  ;;  %v661_v26 = vpack.c.bf16 %v49_v24, %v48_v23  ;;  %v32_v27 = vld [vmem:[%s1169_s1 + $0x20] sm:$0xff]  ;;  %v33_v28 = vld [vmem:[%s1169_s1 + $0x28] sm:$0xff]  ;;  %v50_v35 = vld [vmem:[%s1169_s1 + $0xb0] sm:$0xff] }
   0x8   :  { %v80_v29 = vld [vmem:[%s1169_s1 + $0x1a0] sm:$0xff]  ;;  %690 = vmatprep.subr.bf16.mxu1 %v689_v21  ;;  %v81_v30 = vld [vmem:[%s1169_s1 + $0x1a8] sm:$0xff]  ;;  %v663_v33 = vpack.c.bf16 %v33_v28, %v32_v27  ;;  %v51_v36 = vld [vmem:[%s1169_s1 + $0xb8] sm:$0xff] }
   0x9   :  { %v64_v31 = vld [vmem:[%s1169_s1 + $0x120] sm:$0xff]  ;;  %v65_v32 = vld [vmem:[%s1169_s1 + $0x128] sm:$0xff]  ;;  %660 = vmatpush3.bf16.msra.mxu0 %v659_v17  ;;  %v693_v34 = vpack.c.bf16 %v81_v30, %v80_v29  ;;  %v34_v37 = vld [vmem:[%s1169_s1 + $0x30] sm:$0xff]  ;;  %v665_v39 = vpack.c.bf16 %v51_v36, %v50_v35 }
   0xa   :  { %662 = vmatprep.subr.bf16.mxu0 %v661_v26  ;;  %v695_v38 = vpack.c.bf16 %v65_v32, %v64_v31  ;;  %v35_v40 = vld [vmem:[%s1169_s1 + $0x38] sm:$0xff]  ;;  %v82_v41 = vld [vmem:[%s1169_s1 + $0x1b0] sm:$0xff]  ;;  %v52_v46 = vld [vmem:[%s1169_s1 + $0xc0] sm:$0xff] }
   0xb   :  { %692 = vmatpush3.bf16.msra.mxu1 %v691_v25  ;;  %v83_v42 = vld [vmem:[%s1169_s1 + $0x1b8] sm:$0xff]  ;;  %v66_v44 = vld [vmem:[%s1169_s1 + $0x130] sm:$0xff]  ;;  %v53_v47 = vld [vmem:[%s1169_s1 + $0xc8] sm:$0xff]  ;;  %v667_v48 = vpack.c.bf16 %v35_v40, %v34_v37 }
   0xc   :  { %694 = vmatprep.subr.bf16.mxu1 %v693_v34  ;;  %v697_v43 = vpack.c.bf16 %v83_v42, %v82_v41  ;;  %v67_v45 = vld [vmem:[%s1169_s1 + $0x138] sm:$0xff]  ;;  %v84_v49 = vld [vmem:[%s1169_s1 + $0x1c0] sm:$0xff]  ;;  %v85_v50 = vld [vmem:[%s1169_s1 + $0x1c8] sm:$0xff]  ;;  %v669_v52 = vpack.c.bf16 %v53_v47, %v52_v46 }
   0xd   :  { %664 = vmatpush3.bf16.msra.mxu0 %v663_v33  ;;  %v699_v51 = vpack.c.bf16 %v67_v45, %v66_v44  ;;  %v36_v53 = vld [vmem:[%s1169_s1 + $0x40] sm:$0xff]  ;;  %v37_v54 = vld [vmem:[%s1169_s1 + $0x48] sm:$0xff]  ;;  %v701_v56 = vpack.c.bf16 %v85_v50, %v84_v49  ;;  %v54_v58 = vld [vmem:[%s1169_s1 + $0xd0] sm:$0xff]  ;;  %v786_v50 = vmov 0.0|0.0  }
   0xe   :  { %666 = vmatprep.subr.bf16.mxu0 %v665_v39  ;;  %v68_v55 = vld [vmem:[%s1169_s1 + $0x140] sm:$0xff]  ;;  %v69_v57 = vld [vmem:[%s1169_s1 + $0x148] sm:$0xff]  ;;  %v55_v59 = vld [vmem:[%s1169_s1 + $0xd8] sm:$0xff]  ;;  %v671_v62 = vpack.c.bf16 %v37_v54, %v36_v53 }
   0xf   :  { %696 = vmatpush3.bf16.msra.mxu1 %v695_v38  ;;  %v86_v60 = vld [vmem:[%s1169_s1 + $0x1d0] sm:$0xff]  ;;  %v87_v61 = vld [vmem:[%s1169_s1 + $0x1d8] sm:$0xff]  ;;  %v703_v63 = vpack.c.bf16 %v69_v57, %v68_v55  ;;  %v673_v0 = vpack.c.bf16 %v55_v59, %v54_v58  ;;  %v56_v6 = vld [vmem:[%s1169_s1 + $0xe0] sm:$0xff] }
  0x10   :  { %698 = vmatprep.subr.bf16.mxu1 %v697_v43  ;;  %v38_v1 = vld [vmem:[%s1169_s1 + $0x50] sm:$0xff]  ;;  %v39_v2 = vld [vmem:[%s1169_s1 + $0x58] sm:$0xff]  ;;  %v705_v4 = vpack.c.bf16 %v87_v61, %v86_v60  ;;  %v57_v7 = vld [vmem:[%s1169_s1 + $0xe8] sm:$0xff] }
  0x11   :  { %668 = vmatpush3.bf16.msra.mxu0 %v667_v48  ;;  %v70_v3 = vld [vmem:[%s1169_s1 + $0x150] sm:$0xff]  ;;  %v71_v5 = vld [vmem:[%s1169_s1 + $0x158] sm:$0xff]  ;;  %v88_v8 = vld [vmem:[%s1169_s1 + $0x1e0] sm:$0xff]  ;;  %v675_v10 = vpack.c.bf16 %v39_v2, %v38_v1  ;;  %v677_v14 = vpack.c.bf16 %v57_v7, %v56_v6 }
  0x12   :  { %670 = vmatprep.subr.bf16.mxu0 %v669_v52  ;;  %v89_v9 = vld [vmem:[%s1169_s1 + $0x1e8] sm:$0xff]  ;;  %v40_v11 = vld [vmem:[%s1169_s1 + $0x60] sm:$0xff]  ;;  %v707_v13 = vpack.c.bf16 %v71_v5, %v70_v3  ;;  %v58_v19 = vld [vmem:[%s1169_s1 + $0xf0] sm:$0xff] }
  0x13   :  { %700 = vmatpush3.bf16.msra.mxu1 %v699_v51  ;;  %v22_v12 = vld [vmem:[%s1168_s0 + $0x8] sm:$0xff]  ;;  %v72_v16 = vld [vmem:[%s1169_s1 + $0x160] sm:$0xff]  ;;  %v709_v18 = vpack.c.bf16 %v89_v9, %v88_v8  ;;  %v59_v20 = vld [vmem:[%s1169_s1 + $0xf8] sm:$0xff] }
  0x14   :  { %702 = vmatprep.subr.bf16.mxu1 %v701_v56  ;;  %v41_v15 = vld [vmem:[%s1169_s1 + $0x68] sm:$0xff]  ;;  %201 = vmatprep.mubr.f32.mxu0 %v22_v12  ;;  %v24_v21 = vld [vmem:[%s1168_s0 + $0x18] sm:$0xff]  ;;  %v90_v22 = vld [vmem:[%s1169_s1 + $0x1f0] sm:$0xff]  ;;  %v681_v26 = vpack.c.bf16 %v59_v20, %v58_v19 }
  0x15   :  { %672 = vmatpush3.bf16.msra.mxu0 %v671_v62  ;;  %v73_v17 = vld [vmem:[%s1169_s1 + $0x168] sm:$0xff]  ;;  %v91_v23 = vld [vmem:[%s1169_s1 + $0x1f8] sm:$0xff]  ;;  %271 = vmatprep.mubr.f32.mxu1 %v24_v21  ;;  %v679_v24 = vpack.c.bf16 %v41_v15, %v40_v11  ;;  %v42_v27 = vld [vmem:[%s1169_s1 + $0x70] sm:$0xff] }
  0x16   :  { %674 = vmatprep.subr.bf16.mxu0 %v673_v0  ;;  %v711_v25 = vpack.c.bf16 %v73_v17, %v72_v16  ;;  %v43_v28 = vld [vmem:[%s1169_s1 + $0x78] sm:$0xff]  ;;  %v74_v29 = vld [vmem:[%s1169_s1 + $0x170] sm:$0xff]  ;;  %v713_v30 = vpack.c.bf16 %v91_v23, %v90_v22  ;;  %v108_v32 = vld [vmem:[%s1169_s1 + $0x280] sm:$0xff] }
  0x17   :  { %704 = vmatpush3.bf16.msra.mxu1 %v703_v63  ;;  %v75_v31 = vld [vmem:[%s1169_s1 + $0x178] sm:$0xff]  ;;  %v109_v33 = vld [vmem:[%s1169_s1 + $0x288] sm:$0xff]  ;;  %v683_v34 = vpack.c.bf16 %v43_v28, %v42_v27  ;;  %v92_v37 = vld [vmem:[%s1169_s1 + $0x200] sm:$0xff] }
  0x18   :  { %706 = vmatprep.subr.bf16.mxu1 %v705_v4  ;;  %v715_v35 = vpack.c.bf16 %v75_v31, %v74_v29  ;;  %v717_v36 = vpack.c.bf16 %v109_v33, %v108_v32  ;;  %v93_v38 = vld [vmem:[%s1169_s1 + $0x208] sm:$0xff]  ;;  %v110_v39 = vld [vmem:[%s1169_s1 + $0x290] sm:$0xff]  ;;  %v111_v40 = vld [vmem:[%s1169_s1 + $0x298] sm:$0xff] }
  0x19   :  { %676 = vmatpush3.bf16.msra.mxu0 %v675_v10  ;;  %v21_v41 = vld [vmem:[%s1168_s0] sm:$0xff]  ;;  %v719_v42 = vpack.c.bf16 %v93_v38, %v92_v37  ;;  %v23_v43 = vld [vmem:[%s1168_s0 + $0x10] sm:$0xff]  ;;  %v721_v45 = vpack.c.bf16 %v111_v40, %v110_v39  ;;  %v95_v46 = vld [vmem:[%s1169_s1 + $0x218] sm:$0xff] }
  0x1a   :  { %678 = vmatprep.subr.bf16.mxu0 %v677_v14  ;;  %v94_v44 = vld [vmem:[%s1169_s1 + $0x210] sm:$0xff]  ;;  %v112_v47 = vld [vmem:[%s1169_s1 + $0x2a0] sm:$0xff]  ;;  %v113_v48 = vld [vmem:[%s1169_s1 + $0x2a8] sm:$0xff] }
  0x1b   :  { %708 = vmatpush3.bf16.msra.mxu1 %v707_v13  ;;  %v26_v49 = vld [vmem:[%s1168_s0 + $0x28] sm:$0xff]  ;;  %v124_v51 = vld [vmem:[%s1169_s1 + $0x300] sm:$0xff] }
  0x1c   :  { %710 = vmatprep.subr.bf16.mxu1 %v709_v18  ;;  %v125_v52 = vld [vmem:[%s1169_s1 + $0x308] sm:$0xff] }
  0x1d   :  { %680 = vmatpush3.bf16.msra.mxu0 %v679_v24  ;;  %v750_v53 = vpack.c.bf16 %v125_v52, %v124_v51 }
  0x1e   :  { %682 = vmatprep.subr.bf16.mxu0 %v681_v26 }
  0x1f   :  { %712 = vmatpush3.bf16.msra.mxu1 %v711_v25 }
  0x20   :  { %714 = vmatprep.subr.bf16.mxu1 %v713_v30 }
  0x21   :  { %684 = vmatpush3.bf16.msra.mxu0 %v683_v34 }
  0x22   :  { %718 = vmatprep.subr.bf16.mxu0 %v717_v36 }
  0x23   :  { %716 = vmatpush3.bf16.msra.mxu1 %v715_v35 }
  0x24   :  { %749 = vmatprep.subr.bf16.mxu1 %v786_v50  ;;  %202 = vmatmul.mubr.f32.vlgmr.msra.gmra.mrb[0].mxu0 %v21_v41 }
  0x25   :  { %10 = vsyncpa [#allocation3], 0  ;;  %720 = vmatpush3.bf16.msra.mxu0 %v719_v42  ;;  %v723_v54 = vpack.c.bf16 %v95_v46, %v94_v44  ;;  %v725_v55 = vpack.c.bf16 %v113_v48, %v112_v47  ;;  %v96_v56 = vld [vmem:[%s1169_s1 + $0x220] sm:$0xff]  ;;  %v97_v57 = vld [vmem:[%s1169_s1 + $0x228] sm:$0xff]  ;;  %341 = vmatprep.mubr.f32.mxu0 %v26_v49  ;;  %vm787_vm0 = vmmov 0   ;;  %v788_v60 = vmov 0.0  }
  0x26   :  { %272 = vmatmul.mubr.f32.vlgmr.msra.gmra.mrb[0].mxu1 %v23_v43  ;;  %722 = vmatprep.subr.bf16.mxu0 %v721_v45  ;;  %v114_v58 = vld [vmem:[%s1169_s1 + $0x2b0] sm:$0xff]  ;;  %v115_v59 = vld [vmem:[%s1169_s1 + $0x2b8] sm:$0xff]  ;;  %vm133_vm1 = vcmask 130048   ;;  %v727_v62 = vpack.c.bf16 %v97_v57, %v96_v56  ;;  %v116_v2 = vld [vmem:[%s1169_s1 + $0x2c0] sm:$0xff]  ;;  %vm429_vm2 = vcmask 261120  }
  0x27   :  { %751 = vmatpush3.bf16.msra.mxu1 %v750_v53  ;;  %639 = vmatprep.mubr.msk.f32.mxu1 %vm787_vm0, %v788_v60  ;;  %v27_v61 = vld [vmem:[%s1168_s0 + $0x30] sm:$0xff]  ;;  %v729_v63 = vpack.c.bf16 %v115_v59, %v114_v58  ;;  %v99_v1 = vld [vmem:[%s1169_s1 + $0x238] sm:$0xff]  ;;  %v117_v3 = vld [vmem:[%s1169_s1 + $0x2c8] sm:$0xff] }
  0x28   :  { %752 = vmatprep.subr.bf16.mxu1 %v786_v50  ;;  %v98_v0 = vld [vmem:[%s1169_s1 + $0x230] sm:$0xff]  ;;  %v733_v5 = vpack.c.bf16 %v117_v3, %v116_v2  ;;  %v100_v6 = vld [vmem:[%s1169_s1 + $0x240] sm:$0xff]  ;;  %v101_v7 = vld [vmem:[%s1169_s1 + $0x248] sm:$0xff] }
  0x29   :  { %724 = vmatpush3.bf16.msra.mxu0 %v723_v54  ;;  %v731_v4 = vpack.c.bf16 %v99_v1, %v98_v0  ;;  %v118_v8 = vld [vmem:[%s1169_s1 + $0x2d0] sm:$0xff]  ;;  %v119_v9 = vld [vmem:[%s1169_s1 + $0x2d8] sm:$0xff]  ;;  %v735_v10 = vpack.c.bf16 %v101_v7, %v100_v6  ;;  %v120_v14 = vld [vmem:[%s1169_s1 + $0x2e0] sm:$0xff] }
  0x2a   :  { %726 = vmatprep.subr.bf16.mxu0 %v725_v55  ;;  %640 = vmatmul.mubr.msk.f32.vlgmr.msra.gmra.mrb[2].mxu1 %vm133_vm1, %v27_v61  ;;  %v737_v11 = vpack.c.bf16 %v119_v9, %v118_v8  ;;  %v102_v12 = vld [vmem:[%s1169_s1 + $0x250] sm:$0xff]  ;;  %v103_v13 = vld [vmem:[%s1169_s1 + $0x258] sm:$0xff]  ;;  %v121_v15 = vld [vmem:[%s1169_s1 + $0x2e8] sm:$0xff] }
  0x2b   :  { %650 = vmatprep.mubr.msk.f32.mxu1 %vm787_vm0, %v788_v60  ;;  %v739_v16 = vpack.c.bf16 %v103_v13, %v102_v12  ;;  %v741_v17 = vpack.c.bf16 %v121_v15, %v120_v14  ;;  %v104_v18 = vld [vmem:[%s1169_s1 + $0x260] sm:$0xff]  ;;  %v105_v19 = vld [vmem:[%s1169_s1 + $0x268] sm:$0xff]  ;;  %v122_v20 = vld [vmem:[%s1169_s1 + $0x2f0] sm:$0xff] }
  0x2c   :  { %v123_v21 = vld [vmem:[%s1169_s1 + $0x2f8] sm:$0xff]  ;;  %v743_v22 = vpack.c.bf16 %v105_v19, %v104_v18  ;;  %v106_v24 = vld [vmem:[%s1169_s1 + $0x270] sm:$0xff]  ;;  %v25_v27 = vld [vmem:[%s1168_s0 + $0x20] sm:$0xff] }
  0x2d   :  { %728 = vmatpush3.bf16.msra.mxu0 %v727_v62  ;;  %v745_v23 = vpack.c.bf16 %v123_v21, %v122_v20  ;;  %v107_v25 = vld [vmem:[%s1169_s1 + $0x278] sm:$0xff]  ;;  %v418_v28 = vld [vmem:[%s1171_s3] sm:$0xff]  ;;  %v419_v29 = vld [vmem:[%s1171_s3 + $0x8] sm:$0xff] }
  0x2e   :  { %730 = vmatprep.subr.bf16.mxu0 %v729_v63  ;;  %v747_v26 = vpack.c.bf16 %v107_v25, %v106_v24  ;;  %v753_v30 = vpack.c.bf16 %v419_v29, %v418_v28  ;;  %v420_v31 = vld [vmem:[%s1171_s3 + $0x10] sm:$0xff]  ;;  %v421_v32 = vld [vmem:[%s1171_s3 + $0x18] sm:$0xff]  ;;  %v518_v35 = vld [vmem:[%s1170_s2] ss:$0 sm:$0xff]  ;;  %s789_s2 = smov [#allocation2]  }
  0x2f   :  { %v756_v33 = vpack.c.bf16 %v421_v32, %v420_v31  ;;  %v520_v51 = vld [vmem:[%s1172_s4] ss:$0 sm:$0xff]  ;;  %s510_s12 = sshll.u32 %s789_s2, 4  ;;  %s511_s12 = int_to_ptr.vmem [resolvable:$true] %s510_s12 }
  0x30   :  { %754 = vmatpush3.bf16.msra.mxu1 %v753_v30  ;;  %s762_s13 = scalar_lea.vmem %s511_s12, 128  ;;  %p767_p1 = scmp.lt.s32.totalorder %s511_s12, %s511_s12 }
  0x31   :  { %732 = vmatpush3.bf16.msra.mxu0 %v731_v4  ;;  %755 = vmatprep.subr.bf16.mxu1 %v786_v50  ;;  %p763_p0 = scmp.ne.s32.totalorder %s511_s12, %s762_s13  ;;  %p768_p2 = scmp.lt.s32.totalorder %s762_s13, %s762_s13 }
  0x32   :  { %734 = vmatprep.subr.bf16.mxu0 %v733_v5 }
  0x33   :  { %p769_p3 = por %p768_p2, %p767_p1 }
  0x34   :  { %757 = vmatpush3.bf16.msra.mxu1 %v756_v33 }
  0x35   :  { %736 = vmatpush3.bf16.msra.mxu0 %v735_v10  ;;  %p770_p4 = pnand %p769_p3, %p763_p0 }
  0x36   :  { %738 = vmatprep.subr.bf16.mxu0 %v737_v11 }
  0x39   :  { %740 = vmatpush3.bf16.msra.mxu0 %v739_v16 }
  0x3a   :  { %742 = vmatprep.subr.bf16.mxu0 %v741_v17 }
  0x3d   :  { %744 = vmatpush3.bf16.msra.mxu0 %v743_v22 }
  0x3e   :  { %746 = vmatprep.subr.bf16.mxu0 %v745_v23 }
  0x41   :  { %748 = vmatpush3.bf16.msra.mxu0 %v747_v26 }
  0x44   :  { %342 = vmatmul.mubr.f32.vlgmr.msra.gmra.mrb[2].mxu0 %v25_v27 }
  0xf7   :  { %v554_v34 = vpop.f32.mrb[0].mxu0 }
  0xf8   :  { %v555_v36 = vpop.f32.mrb[1].mxu0 }
  0xf9   :  { %v589_v37 = vpop.f32.mrb[0].mxu1  ;;  %v556_v38 = vadd.f32 %v555_v36, %v554_v34 }
  0xfa   :  { %v590_v39 = vpop.f32.mrb[1].mxu1 }
  0xfb   :  { %v591_v40 = vadd.f32 %v590_v39, %v589_v37  ;;  %v204_v41 = vadd.f32 %v556_v38, %v518_v35 }
  0xfd   :  { %v274_v42 = vadd.f32 %v591_v40, %v204_v41  ;;  %v413_v43 = vpop.f32.mrb[2].mxu1 }
  0xfe   :  { %v641_v44 = vpop.f32.mrb[3].mxu1 }
 0x117   :  { %v624_v45 = vpop.f32.mrb[2].mxu0 }
 0x118   :  { %v625_v46 = vpop.f32.mrb[3].mxu0 }
 0x119   :  { %v626_v47 = vadd.f32 %v625_v46, %v624_v45 }
 0x11b   :  { %v344_v48 = vadd.f32 %v626_v47, %v274_v42 }
 0x11d   :  { %v414_v49 = vadd.f32 %v413_v43, %v344_v48 }
 0x11f   :  { %v417_v50 = vmax.f32 %v414_v49, 0.0 }
 0x121   :  { %651 = vmatmul.mubr.msk.f32.vlgmr.msra.gmra.mrb[4].mxu1 %vm429_vm2, %v417_v50 }
 0x1f4   :  { %v499_v52 = vpop.f32.mrb[4].mxu1 }
 0x1f5   :  { %v500_v53 = vadd.f32 %v520_v51, %v499_v52  ;;  %v652_v54 = vpop.f32.mrb[5].mxu1 }
 0x1f7   :  { %503 = vst [vmem:[#allocation2] sm:$0xff] %v500_v53 }
 0x1f8   :  { %773 = shalt.err (!%p770_p4)
}
 0x1f9   :  { %s774_s16 = scalar_lea.hbm %s1173_s5, 128 }
 0x1fa   :  { %p775_p5 = scmp.ne.s32.totalorder %s1173_s5, %s774_s16  ;;  %p778_p6 = scmp.lt.u32.totalorder %s774_s16, %s1173_s5 }
 0x1fc   :  { %p780_p7 = pnand %p778_p6, %p775_p5 }
 0x1fe   :  { %783 = shalt.err (!%p780_p7)
}
 0x1ff   :  { %513 = dma.vmem_to_hbm [thread:$0]  %s511_s12, 128, %s1173_s5, [#allocation3]  }
 0x200   :  { %784 = dma.done.wait [#allocation3], 128  }
 0x201   :  { %785 = vsyncadd [#allocation3], 4294967168 }
 0x202   :  { %517 = vsyncpa [#allocation3], 1 }

</bundles_post_ra>
